<compile_context>
chip_gen: v7x
topology: tpu7x:2x2x1
jax: 0.10.0
libtpu: 0.0.40
codegen_flags: <defaults>
</compile_context>

<pallas_src>
import jax
import jax.numpy as jnp
from jax.experimental import pallas as pl
from jax.experimental.pallas import tpu as pltpu

_LANES = 128


def _cdiv(a, b):
    return -(-a // b)


def _round_up(n, m):
    return _cdiv(n, m) * m


def _single_k_kernel(x_ref, w_ref, b_ref, o_ref):
    # Whole feature dim in one tile (TK == D): broadcast-multiply + one reduce,
    # fully hidden under the x DMA. No accumulator needed.
    prod = x_ref[...].astype(jnp.float32) * w_ref[...].astype(jnp.float32)
    o_ref[...] = (jnp.sum(prod, axis=-1, keepdims=True)
                  + b_ref[0, 0]).astype(o_ref.dtype)


def _make_multi_k_kernel(D, TK, last_valid):
    n_groups = TK // _LANES

    def kernel(x_ref, w_ref, b_ref, o_ref, acc_ref):
        # x_ref:   [TB, TK]      VMEM (batch tile x feature slice, streamed)
        # w_ref:   [num_k, TK]   VMEM (whole weight row, resident; row k per step)
        # b_ref:   [1, 1]        SMEM (scalar bias)
        # o_ref:   [TB, 1]       VMEM (written once, at the last K step)
        # acc_ref: [TB, 128]     f32 VMEM lane-dense accumulator
        k = pl.program_id(1)

        @pl.when(k == 0)
        def _():
            acc_ref[...] = jnp.zeros_like(acc_ref)

        w_row = w_ref[pl.ds(k, 1), :].astype(jnp.float32)        # (1, TK)
        limit = D - k * TK          # valid lanes this step (== TK except last)
        col = jax.lax.broadcasted_iota(jnp.int32, (1, _LANES), 1)

        # Lane-dense partial sums (VPU-only per step); the single cross-lane
        # (XLU) reduce is deferred to the epilogue below.
        for g in range(n_groups):
            lo, hi = g * _LANES, (g + 1) * _LANES
            sl = x_ref[:, lo:hi].astype(jnp.float32) * w_row[:, lo:hi]
            if hi > last_valid:
                # This lane-group reaches past D on the ragged last K step;
                # the stale VMEM there may be anything (even NaN) -> mask.
                # On non-last steps the condition is all-true (no-op).
                sl = jnp.where(col + lo < limit, sl, 0.0)
            acc_ref[...] += sl

        @pl.when(k == pl.num_programs(1) - 1)
        def _():
            o_ref[...] = (jnp.sum(acc_ref[...], axis=-1, keepdims=True)
                          + b_ref[0, 0]).astype(o_ref.dtype)

    return kernel


def concise_linear_forward(x, weight, bias, *, tb_max=1024, tk_max=2048):
    """x: [B, D], weight: [1, D] (PyTorch layout), bias: [1]  ->  [B, 1].

    Defaults give ~8 MiB f32 x-tiles (double-buffered ~17 MiB VMEM) — safe on
    v5e/v6e/v7x. On v7x, tb_max=2048 or tk_max=4096 (~16 MiB tiles) still fits
    under the 48 MiB scoped limit set below.
    """
    B, D = x.shape
    assert weight.shape == (1, D)

    itemsize = jnp.dtype(x.dtype).itemsize
    sub = {4: 8, 2: 16, 1: 32}.get(itemsize, 8)       # sublane packing per dtype

    tb_max = max(sub, (tb_max // sub) * sub)
    tk_max = max(_LANES, (tk_max // _LANES) * _LANES)

    # Batch tile: biggest packing-aligned tile <= tb_max, but guarantee >= 2
    # batch tiles whenever B allows so the "parallel" axis spans both v7x TCs.
    TB = min(tb_max, _round_up(B, sub))
    if B > sub and _cdiv(B, TB) < 2:
        TB = _round_up(_cdiv(B, 2), sub)
    num_b = _cdiv(B, TB)

    bias_2d = jnp.asarray(bias, jnp.float32).reshape(1, 1)

    # 48 MiB scoped VMEM: below v7x's 64 MiB physical, plenty on v5e/v6e (128).
    vmem_limit = 48 * 1024 * 1024

    if D <= tk_max:
        # Single K step: no accumulator, full weight row resident in VMEM.
        return pl.pallas_call(
            _single_k_kernel,
            out_shape=jax.ShapeDtypeStruct((B, 1), x.dtype),
            grid_spec=pltpu.PrefetchScalarGridSpec(
                num_scalar_prefetch=0,
                grid=(num_b,),
                in_specs=[
                    pl.BlockSpec((TB, D), lambda i: (i, 0)),   # x: streamed tiles
                    pl.BlockSpec((1, D), lambda i: (0, 0)),    # w: resident
                    pl.BlockSpec(memory_space=pltpu.MemorySpace.SMEM),
                ],
                out_specs=pl.BlockSpec((TB, 1), lambda i: (i, 0)),
            ),
            compiler_params=pltpu.CompilerParams(
                dimension_semantics=("parallel",),
                vmem_limit_bytes=vmem_limit,
            ),
        )(x, weight, bias_2d)

    # Multi-step reduction over D (reduction axis last in the grid).
    TK = tk_max
    num_k = _cdiv(D, TK)
    last_valid = D - (num_k - 1) * TK     # valid lanes of the ragged last K tile

    # Only the tiny [1, D] weight row is padded/reshaped on the host
    # (negligible); the big operand x is streamed as-is with the ragged tail
    # masked in-kernel.
    w_tab = jnp.pad(weight, ((0, 0), (0, num_k * TK - D))).reshape(num_k, TK)

    kernel = _make_multi_k_kernel(D, TK, last_valid)

    return pl.pallas_call(
        kernel,
        out_shape=jax.ShapeDtypeStruct((B, 1), x.dtype),
        grid_spec=pltpu.PrefetchScalarGridSpec(
            num_scalar_prefetch=0,
            grid=(num_b, num_k),
            in_specs=[
                pl.BlockSpec((TB, TK), lambda i, k: (i, k)),      # x: streamed
                pl.BlockSpec((num_k, TK), lambda i, k: (0, 0)),   # w: resident table
                pl.BlockSpec(memory_space=pltpu.MemorySpace.SMEM),
            ],
            out_specs=pl.BlockSpec((TB, 1), lambda i, k: (i, 0)),
            scratch_shapes=[pltpu.VMEM((TB, _LANES), jnp.float32)],
        ),
        compiler_params=pltpu.CompilerParams(
            dimension_semantics=("parallel", "arbitrary"),
            vmem_limit_bytes=vmem_limit,
        ),
    )(x, w_tab, bias_2d)


if __name__ == "__main__":
    key = jax.random.PRNGKey(0)
    k1, k2, k3, k4, k5, k6 = jax.random.split(key, 6)

    # --- 1) small shape matching the module (LazyLinear infers D) -------------
    B, D = 8, 32
    x = jax.random.normal(k1, (B, D), dtype=jnp.float32)
    weight = 0.01 * jax.random.normal(k2, (1, D), dtype=jnp.float32)   # N(0, 0.01)
    bias = jnp.zeros((1,), dtype=jnp.float32)                          # bias = 0
    out = concise_linear_forward(x, weight, bias)
    jax.block_until_ready(out)
    ref = x @ weight.T + bias
    assert out.shape == (B, 1)
    assert jnp.allclose(out, ref, atol=1e-5, rtol=1e-5)

    # --- 2) ragged batch + multi-step D reduction, no host padding of x -------
    B2, D2 = 20, 200
    x2 = jax.random.normal(k3, (B2, D2), dtype=jnp.float32)
    w2 = 0.01 * jax.random.normal(k4, (1, D2), dtype=jnp.float32)
    b2 = jnp.full((1,), 0.25, dtype=jnp.float32)
    out2 = concise_linear_forward(x2, w2, b2, tb_max=8, tk_max=128)
    jax.block_until_ready(out2)
    ref2 = x2 @ w2.T + b2
    assert out2.shape == (B2, 1)
    assert jnp.allclose(out2, ref2, atol=1e-5, rtol=1e-5)

    # --- 3) bf16 streaming with f32 accumulation (ragged last K tile) ---------
    B3, D3 = 24, 300
    x3 = jax.random.normal(k5, (B3, D3), dtype=jnp.float32).astype(jnp.bfloat16)
    w3 = (0.01 * jax.random.normal(k6, (1, D3), dtype=jnp.float32)).astype(jnp.bfloat16)
    b3 = jnp.zeros((1,), dtype=jnp.float32)
    out3 = concise_linear_forward(x3, w3, b3, tb_max=32, tk_max=128)
    jax.block_until_ready(out3)
    ref3 = (x3.astype(jnp.float32) @ w3.astype(jnp.float32).T + b3).astype(jnp.bfloat16)
    assert out3.shape == (B3, 1)
    assert jnp.allclose(out3.astype(jnp.float32), ref3.astype(jnp.float32),
                        atol=1e-2, rtol=1e-2)

    print("KERNEL_OK")
</pallas_src>

<mosaic_0001>
module attributes {stable_mosaic.version = 11 : i64} {
  func.func @_single_k_kernel(%arg0: i32, %arg1: memref<8x32xf32, #tpu.memory_space<vmem>>, %arg2: memref<1x32xf32, #tpu.memory_space<vmem>>, %arg3: memref<1x1xf32, #tpu.memory_space<smem>>, %arg4: memref<8x1xf32, #tpu.memory_space<vmem>>) attributes {dimension_semantics = [#tpu.dimension_semantics<parallel>], iteration_bounds = array<i64: 1>, scalar_prefetch = 0 : i64, scratch_operands = 0 : i64, tpu.core_type = #tpu.core_type<tc>, window_params = [{transform_indices = @transform_0, window_bounds = array<i64: 8, 32>}, {pipeline_mode = #tpu.pipeline_mode<synchronous>, transform_indices = @transform_1, window_bounds = array<i64: 1, 32>}, {transform_indices = @transform_2, window_bounds = array<i64: 1, 1>}, {transform_indices = @transform_3, window_bounds = array<i64: 8, 1>}]} {
    %c0 = arith.constant 0 : index
    %c0_0 = arith.constant 0 : index
    %0 = vector.load %arg1[%c0, %c0_0] : memref<8x32xf32, #tpu.memory_space<vmem>>, vector<8x32xf32>
    %c0_1 = arith.constant 0 : index
    %c0_2 = arith.constant 0 : index
    %1 = vector.load %arg2[%c0_1, %c0_2] : memref<1x32xf32, #tpu.memory_space<vmem>>, vector<1x32xf32>
    %2 = vector.broadcast %1 : vector<1x32xf32> to vector<8x32xf32>
    %3 = arith.mulf %0, %2 : vector<8x32xf32>
    %cst = arith.constant dense<0.000000e+00> : vector<8xf32>
    %4 = vector.multi_reduction <add>, %3, %cst [1] : vector<8x32xf32> to vector<8xf32>
    %5 = vector.shape_cast %4 : vector<8xf32> to vector<8x1xf32>
    %c0_3 = arith.constant 0 : index
    %c0_4 = arith.constant 0 : index
    %6 = memref.load %arg3[%c0_3, %c0_4] : memref<1x1xf32, #tpu.memory_space<smem>>
    %7 = vector.broadcast %6 : f32 to vector<8x1xf32>
    %8 = arith.addf %5, %7 : vector<8x1xf32>
    %c0_5 = arith.constant 0 : index
    %c0_6 = arith.constant 0 : index
    %9 = vector.load %arg4[%c0_5, %c0_6] : memref<8x1xf32, #tpu.memory_space<vmem>>, vector<8x1xf32>
    tpu.vector_store %arg4[%c0_5, %c0_6], %8 {strides = array<i32>} : memref<8x1xf32, #tpu.memory_space<vmem>>, vector<8x1xf32>,
    return
  }
  func.func @transform_0(%arg0: i32) -> (i32, i32) {
    %c0_i32 = arith.constant 0 : i32
    %c0_i32_0 = arith.constant 0 : i32
    return %arg0, %c0_i32 : i32, i32
  }
  func.func @transform_1(%arg0: i32) -> (i32, i32) {
    %c0_i32 = arith.constant 0 : i32
    %c0_i32_0 = arith.constant 0 : i32
    %c0_i32_1 = arith.constant 0 : i32
    return %c0_i32, %c0_i32_0 : i32, i32
  }
  func.func @transform_2(%arg0: i32) -> (i32, i32) {
    %c0_i32 = arith.constant 0 : i32
    %c0_i32_0 = arith.constant 0 : i32
    %c0_i32_1 = arith.constant 0 : i32
    return %c0_i32, %c0_i32_0 : i32, i32
  }
  func.func @transform_3(%arg0: i32) -> (i32, i32) {
    %c0_i32 = arith.constant 0 : i32
    %c0_i32_0 = arith.constant 0 : i32
    return %arg0, %c0_i32 : i32, i32
  }
}

</mosaic_0001>

<bundles_post_ra>
// kernel: tpu_custom_call.1
= control target key start
LH: loop header
LB: loop body
LE: loop exit
PB: predicated region body
PF: predicated region fallthrough
CT: control target
= control target key end

     0   :  { %9 = vsyncpa [#allocation4], 0  ;;  %s76_s12 = smov [#allocation3]   ;;  %s118_s0 = inlined_call_operand.hbm [shape: f32[8,32], index: 0, kind: input, shape index: {}]   ;;  %s119_s1 = inlined_call_operand.vmem [shape: f32[1,32], index: 1, kind: input, shape index: {}]   ;;  %s120_s2 = inlined_call_operand.<no memory space> [shape: f32[1,1], index: 2, kind: input, shape index: {}]   ;;  %s121_s3 = inlined_call_operand.vmem [shape: f32[8,1], index: 3, kind: output, shape index: {}]  }
   0x1   :  { %s16_s13 = sshll.u32 %s76_s12, 4  ;;  %s52_s16 = scalar_lea.hbm %s118_s0, 128  ;;  %s17_s13 = int_to_ptr.vmem [resolvable:$true] %s16_s13 }
   0x2   :  { %p53_p0 = scmp.ne.s32.totalorder %s118_s0, %s52_s16  ;;  %p56_p1 = scmp.lt.u32.totalorder %s52_s16, %s118_s0 }
   0x4   :  { %p58_p2 = pnand %p56_p1, %p53_p0 }
   0x6   :  { %61 = shalt.err (!%p58_p2)
}
   0x7   :  { %s62_s21 = scalar_lea.vmem %s17_s13, 128  ;;  %p67_p4 = scmp.lt.s32.totalorder %s17_s13, %s17_s13 }
   0x8   :  { %p63_p3 = scmp.ne.s32.totalorder %s17_s13, %s62_s21  ;;  %p68_p5 = scmp.lt.s32.totalorder %s62_s21, %s62_s21 }
   0xa   :  { %p69_p6 = por %p68_p5, %p67_p4 }
   0xc   :  { %p70_p7 = pnand %p69_p6, %p63_p3 }
   0xe   :  { %73 = shalt.err (!%p70_p7)
}
   0xf   :  { %19 = dma.hbm_to_vmem [thread:$0]  %s118_s0, 128, %s17_s13, [#allocation4]  }
  0x10   :  { %74 = dma.done.wait [#allocation4], 128  }
  0x11   :  { %75 = vsyncadd [#allocation4], 4294967168  ;;  %v27_v0 = vld [vmem:[#allocation3] sm:$0xff]  ;;  %vm36_vm0 = vcmask 261120   ;;  %v41_v4 = vstv %s120_s2  ;;  %vm43_vm1 = vcmask 7168  }
  0x12   :  { %v50_v1 = vld [vmem:[%s119_s1] ss:$0 sm:$0xff] }
  0x13   :  { %v35_v2 = vmul.f32 %v50_v1, %v27_v0 }
  0x15   :  { %v37_v3 = vsel %vm36_vm0, %v35_v2, 0.0 }
  0x16   :  { %38 = vadd.xlane.f32.xlu0 %v37_v3 }
  0xa3   :  { %v39_v5 = vpop.xlane.xlu0 %38 }
  0xa4   :  { %v42_v6 = vadd.f32 %v41_v4, %v39_v5 }
  0xa6   :  { %44 = vst.msk [vmem:[%s121_s3] sm:$0xff] %vm43_vm1, %v42_v6 }
  0xa7   :  { %49 = vsyncpa [#allocation4], 1 }

</bundles_post_ra>
